<compile_context>
chip_gen: v6e
topology: v6e:2x2x1
jax: 0.10.0
libtpu: 0.0.40
codegen_flags: <defaults>
</compile_context>

<pallas_src>
import functools

import jax
import jax.numpy as jnp
from jax.experimental import pallas as pl
from jax.experimental.pallas import tpu as pltpu

LANE = 128      # vreg lane width
SUBLANE = 8     # f32 sublanes per vreg


def _round_up(x, m):
    return (x + m - 1) // m * m


def _pad2d(x, rows, cols):
    r, c = x.shape
    return jnp.pad(x, ((0, rows - r), (0, cols - c)))


def qnet_kernel(inp_ref, hs_ref, w_ref, b_ref, out_ref, h_out_ref, *, P):
    # Packed weights: [w_in | w_h | w_h2 | w_h3 | w_out], each (P, P).
    w_in  = w_ref[:, 0 * P:1 * P]
    w_h   = w_ref[:, 1 * P:2 * P]
    w_h2  = w_ref[:, 2 * P:3 * P]
    w_h3  = w_ref[:, 3 * P:4 * P]
    w_out = w_ref[:, 4 * P:5 * P]
    # Packed biases: [b_h | b_h2 | b_h3 | b_out], each (1, P).
    b_h   = b_ref[:, 0 * P:1 * P]
    b_h2  = b_ref[:, 1 * P:2 * P]
    b_h3  = b_ref[:, 2 * P:3 * P]
    b_out = b_ref[:, 3 * P:4 * P]

    # inp = relu(self.input(inp))               (no bias)
    x = jnp.dot(inp_ref[...], w_in, preferred_element_type=jnp.float32)
    x = jnp.maximum(x, 0.0)

    # inp = relu(self.hidden(inp))
    x = jnp.dot(x, w_h, preferred_element_type=jnp.float32) + b_h
    x = jnp.maximum(x, 0.0)

    # hidden_state = self.hidden2(hidden_state)
    h = jnp.dot(hs_ref[...], w_h2, preferred_element_type=jnp.float32) + b_h2

    # hidden_state = tanh(inp + hidden_state)
    h_new = jnp.tanh(x + h)

    # out = relu(self.hidden3(hidden_state))
    o = jnp.dot(h_new, w_h3, preferred_element_type=jnp.float32) + b_h3
    o = jnp.maximum(o, 0.0)

    # out = self.output(out)
    o = jnp.dot(o, w_out, preferred_element_type=jnp.float32) + b_out

    out_ref[...] = o.astype(out_ref.dtype)
    h_out_ref[...] = h_new.astype(h_out_ref.dtype)


def linear_qnet_forward(inp, hidden_state, params, *, batch_tile=128):
    """Single-pallas_call forward.  Weights stored (in, out); all feature dims
    zero-padded to a common lane-dense width P; batch padded/tiled over a
    'parallel' grid axis."""
    B, input_size = inp.shape
    hidden_size = params["w_h"].shape[1]
    output_size = params["w_out"].shape[1]

    # Common padded feature width (128 is enough on v5e/v6e/v7x at this size).
    P = _round_up(max(input_size, hidden_size, output_size), LANE)

    # Batch tiling: pad to a sublane multiple, tile at most `batch_tile` rows.
    if B <= batch_tile:
        TB = _round_up(B, SUBLANE)
    else:
        TB = batch_tile
    B_pad = _round_up(B, TB)
    grid = (B_pad // TB,)

    # Pack weights -> (P, 5P), biases -> (1, 4P): one DMA each.
    w_pack = jnp.concatenate(
        [
            _pad2d(params["w_in"], P, P),
            _pad2d(params["w_h"], P, P),
            _pad2d(params["w_h2"], P, P),
            _pad2d(params["w_h3"], P, P),
            _pad2d(params["w_out"], P, P),
        ],
        axis=1,
    )
    b_pack = jnp.concatenate(
        [
            _pad2d(params["b_h"], 1, P),
            _pad2d(params["b_h2"], 1, P),
            _pad2d(params["b_h3"], 1, P),
            _pad2d(params["b_out"], 1, P),
        ],
        axis=1,
    )

    inp_p = _pad2d(inp, B_pad, P)
    hs_p = _pad2d(hidden_state, B_pad, P)

    kernel = functools.partial(qnet_kernel, P=P)

    out_p, h_p = pl.pallas_call(
        kernel,
        grid=grid,
        in_specs=[
            pl.BlockSpec((TB, P), lambda i: (i, 0)),        # inp (batch-tiled)
            pl.BlockSpec((TB, P), lambda i: (i, 0)),        # hidden_state
            pl.BlockSpec((P, 5 * P), lambda i: (0, 0)),     # packed weights
            pl.BlockSpec((1, 4 * P), lambda i: (0, 0)),     # packed biases
        ],
        out_specs=(
            pl.BlockSpec((TB, P), lambda i: (i, 0)),        # out
            pl.BlockSpec((TB, P), lambda i: (i, 0)),        # new hidden_state
        ),
        out_shape=(
            jax.ShapeDtypeStruct((B_pad, P), jnp.float32),
            jax.ShapeDtypeStruct((B_pad, P), jnp.float32),
        ),
        # hidden_state buffer is reused for the new hidden_state (same padded shape).
        input_output_aliases={1: 1},
        compiler_params=pltpu.CompilerParams(
            dimension_semantics=("parallel",)),
    )(inp_p, hs_p, w_pack, b_pack)

    return out_p[:B, :output_size], h_p[:B, :hidden_size]


def init_params(key, input_size, hidden_size, output_size):
    """Deterministic synthetic parameters. Weights stored as (in, out) so the
    kernel computes x @ W directly (equivalent to PyTorch's x @ W_pt.T)."""
    ks = jax.random.split(key, 9)
    scale = 0.1
    return {
        "w_in":  scale * jax.random.normal(ks[0], (input_size, hidden_size), jnp.float32),
        "w_h":   scale * jax.random.normal(ks[1], (hidden_size, hidden_size), jnp.float32),
        "b_h":   scale * jax.random.normal(ks[2], (1, hidden_size), jnp.float32),
        "w_h2":  scale * jax.random.normal(ks[3], (hidden_size, hidden_size), jnp.float32),
        "b_h2":  scale * jax.random.normal(ks[4], (1, hidden_size), jnp.float32),
        "w_h3":  scale * jax.random.normal(ks[5], (hidden_size, hidden_size), jnp.float32),
        "b_h3":  scale * jax.random.normal(ks[6], (1, hidden_size), jnp.float32),
        "w_out": scale * jax.random.normal(ks[7], (hidden_size, output_size), jnp.float32),
        "b_out": scale * jax.random.normal(ks[8], (1, output_size), jnp.float32),
    }


def reference_forward(inp, hidden_state, p):
    x = jax.nn.relu(inp @ p["w_in"])
    x = jax.nn.relu(x @ p["w_h"] + p["b_h"])
    h = hidden_state @ p["w_h2"] + p["b_h2"]
    h_new = jnp.tanh(x + h)
    o = jax.nn.relu(h_new @ p["w_h3"] + p["b_h3"])
    o = o @ p["w_out"] + p["b_out"]
    return o, h_new


if __name__ == "__main__":
    input_size, hidden_size, output_size = 16, 32, 8
    batch = 2

    key = jax.random.PRNGKey(0)
    k_inp, k_hs, k_params = jax.random.split(key, 3)

    inp = jax.random.normal(k_inp, (batch, input_size), jnp.float32)
    hidden_state = jax.random.normal(k_hs, (batch, hidden_size), jnp.float32)
    params = init_params(k_params, input_size, hidden_size, output_size)

    out, h_new = linear_qnet_forward(inp, hidden_state, params)
    jax.block_until_ready((out, h_new))

    ref_out, ref_h = reference_forward(inp, hidden_state, params)
    assert out.shape == (batch, output_size)
    assert h_new.shape == (batch, hidden_size)
    assert jnp.allclose(out, ref_out, atol=1e-5, rtol=1e-5)
    assert jnp.allclose(h_new, ref_h, atol=1e-5, rtol=1e-5)

    print("KERNEL_OK")
</pallas_src>

<mosaic_0001>
module attributes {stable_mosaic.version = 11 : i64} {
  func.func @qnet_kernel(%arg0: i32, %arg1: memref<8x128xf32, #tpu.memory_space<vmem>>, %arg2: memref<8x128xf32, #tpu.memory_space<vmem>>, %arg3: memref<128x640xf32, #tpu.memory_space<vmem>>, %arg4: memref<1x512xf32, #tpu.memory_space<vmem>>, %arg5: memref<8x128xf32, #tpu.memory_space<vmem>>, %arg6: memref<8x128xf32, #tpu.memory_space<vmem>>) attributes {dimension_semantics = [#tpu.dimension_semantics<parallel>], iteration_bounds = array<i64: 1>, scalar_prefetch = 0 : i64, scratch_operands = 0 : i64, tpu.core_type = #tpu.core_type<tc>, window_params = [{transform_indices = @transform_0, window_bounds = array<i64: 8, 128>}, {transform_indices = @transform_1, window_bounds = array<i64: 8, 128>}, {pipeline_mode = #tpu.pipeline_mode<synchronous>, transform_indices = @transform_2, window_bounds = array<i64: 128, 640>}, {pipeline_mode = #tpu.pipeline_mode<synchronous>, transform_indices = @transform_3, window_bounds = array<i64: 1, 512>}, {transform_indices = @transform_4, window_bounds = array<i64: 8, 128>}, {transform_indices = @transform_5, window_bounds = array<i64: 8, 128>}]} {
    %c0 = arith.constant 0 : index
    %c0_0 = arith.constant 0 : index
    %0 = vector.load %arg3[%c0, %c0_0] : memref<128x640xf32, #tpu.memory_space<vmem>>, vector<128x128xf32>
    %c0_1 = arith.constant 0 : index
    %c128 = arith.constant 128 : index
    %1 = vector.load %arg3[%c0_1, %c128] : memref<128x640xf32, #tpu.memory_space<vmem>>, vector<128x128xf32>
    %c0_2 = arith.constant 0 : index
    %c256 = arith.constant 256 : index
    %2 = vector.load %arg3[%c0_2, %c256] : memref<128x640xf32, #tpu.memory_space<vmem>>, vector<128x128xf32>
    %c0_3 = arith.constant 0 : index
    %c384 = arith.constant 384 : index
    %3 = vector.load %arg3[%c0_3, %c384] : memref<128x640xf32, #tpu.memory_space<vmem>>, vector<128x128xf32>
    %c0_4 = arith.constant 0 : index
    %c512 = arith.constant 512 : index
    %4 = vector.load %arg3[%c0_4, %c512] : memref<128x640xf32, #tpu.memory_space<vmem>>, vector<128x128xf32>
    %c0_5 = arith.constant 0 : index
    %c0_6 = arith.constant 0 : index
    %5 = vector.load %arg4[%c0_5, %c0_6] : memref<1x512xf32, #tpu.memory_space<vmem>>, vector<1x128xf32>
    %c0_7 = arith.constant 0 : index
    %c128_8 = arith.constant 128 : index
    %6 = vector.load %arg4[%c0_7, %c128_8] : memref<1x512xf32, #tpu.memory_space<vmem>>, vector<1x128xf32>
    %c0_9 = arith.constant 0 : index
    %c256_10 = arith.constant 256 : index
    %7 = vector.load %arg4[%c0_9, %c256_10] : memref<1x512xf32, #tpu.memory_space<vmem>>, vector<1x128xf32>
    %c0_11 = arith.constant 0 : index
    %c384_12 = arith.constant 384 : index
    %8 = vector.load %arg4[%c0_11, %c384_12] : memref<1x512xf32, #tpu.memory_space<vmem>>, vector<1x128xf32>
    %c0_13 = arith.constant 0 : index
    %c0_14 = arith.constant 0 : index
    %9 = vector.load %arg1[%c0_13, %c0_14] : memref<8x128xf32, #tpu.memory_space<vmem>>, vector<8x128xf32>
    %cst = arith.constant dense<0.000000e+00> : vector<8x128xf32>
    %10 = tpu.matmul %9, %0, %cst {dimension_numbers = #tpu.dot_dimension_numbers<[1], [0], [0], [1], [0, 0, 1, 1], [], []>} : vector<8x128xf32>, vector<128x128xf32>, vector<8x128xf32> -> vector<8x128xf32>
    %cst_15 = arith.constant 0.000000e+00 : f32
    %11 = vector.broadcast %cst_15 : f32 to vector<8x128xf32>
    %12 = arith.maximumf %10, %11 : vector<8x128xf32>
    %cst_16 = arith.constant dense<0.000000e+00> : vector<8x128xf32>
    %13 = tpu.matmul %12, %1, %cst_16 {dimension_numbers = #tpu.dot_dimension_numbers<[1], [0], [0], [1], [0, 0, 1, 1], [], []>} : vector<8x128xf32>, vector<128x128xf32>, vector<8x128xf32> -> vector<8x128xf32>
    %14 = vector.broadcast %5 : vector<1x128xf32> to vector<8x128xf32>
    %15 = arith.addf %13, %14 : vector<8x128xf32>
    %cst_17 = arith.constant 0.000000e+00 : f32
    %16 = vector.broadcast %cst_17 : f32 to vector<8x128xf32>
    %17 = arith.maximumf %15, %16 : vector<8x128xf32>
    %c0_18 = arith.constant 0 : index
    %c0_19 = arith.constant 0 : index
    %18 = vector.load %arg2[%c0_18, %c0_19] : memref<8x128xf32, #tpu.memory_space<vmem>>, vector<8x128xf32>
    %cst_20 = arith.constant dense<0.000000e+00> : vector<8x128xf32>
    %19 = tpu.matmul %18, %2, %cst_20 {dimension_numbers = #tpu.dot_dimension_numbers<[1], [0], [0], [1], [0, 0, 1, 1], [], []>} : vector<8x128xf32>, vector<128x128xf32>, vector<8x128xf32> -> vector<8x128xf32>
    %20 = vector.broadcast %6 : vector<1x128xf32> to vector<8x128xf32>
    %21 = arith.addf %19, %20 : vector<8x128xf32>
    %22 = arith.addf %17, %21 : vector<8x128xf32>
    %23 = math.tanh %22 : vector<8x128xf32>
    %cst_21 = arith.constant dense<0.000000e+00> : vector<8x128xf32>
    %24 = tpu.matmul %23, %3, %cst_21 {dimension_numbers = #tpu.dot_dimension_numbers<[1], [0], [0], [1], [0, 0, 1, 1], [], []>} : vector<8x128xf32>, vector<128x128xf32>, vector<8x128xf32> -> vector<8x128xf32>
    %25 = vector.broadcast %7 : vector<1x128xf32> to vector<8x128xf32>
    %26 = arith.addf %24, %25 : vector<8x128xf32>
    %cst_22 = arith.constant 0.000000e+00 : f32
    %27 = vector.broadcast %cst_22 : f32 to vector<8x128xf32>
    %28 = arith.maximumf %26, %27 : vector<8x128xf32>
    %cst_23 = arith.constant dense<0.000000e+00> : vector<8x128xf32>
    %29 = tpu.matmul %28, %4, %cst_23 {dimension_numbers = #tpu.dot_dimension_numbers<[1], [0], [0], [1], [0, 0, 1, 1], [], []>} : vector<8x128xf32>, vector<128x128xf32>, vector<8x128xf32> -> vector<8x128xf32>
    %30 = vector.broadcast %8 : vector<1x128xf32> to vector<8x128xf32>
    %31 = arith.addf %29, %30 : vector<8x128xf32>
    %c0_24 = arith.constant 0 : index
    %c0_25 = arith.constant 0 : index
    %32 = vector.load %arg5[%c0_24, %c0_25] : memref<8x128xf32, #tpu.memory_space<vmem>>, vector<8x128xf32>
    tpu.vector_store %arg5[%c0_24, %c0_25], %31 {strides = array<i32>} : memref<8x128xf32, #tpu.memory_space<vmem>>, vector<8x128xf32>,
    %c0_26 = arith.constant 0 : index
    %c0_27 = arith.constant 0 : index
    %33 = vector.load %arg6[%c0_26, %c0_27] : memref<8x128xf32, #tpu.memory_space<vmem>>, vector<8x128xf32>
    tpu.vector_store %arg6[%c0_26, %c0_27], %23 {strides = array<i32>} : memref<8x128xf32, #tpu.memory_space<vmem>>, vector<8x128xf32>,
    return
  }
  func.func @transform_0(%arg0: i32) -> (i32, i32) {
    %c0_i32 = arith.constant 0 : i32
    %c0_i32_0 = arith.constant 0 : i32
    return %arg0, %c0_i32 : i32, i32
  }
  func.func @transform_1(%arg0: i32) -> (i32, i32) {
    %c0_i32 = arith.constant 0 : i32
    %c0_i32_0 = arith.constant 0 : i32
    return %arg0, %c0_i32 : i32, i32
  }
  func.func @transform_2(%arg0: i32) -> (i32, i32) {
    %c0_i32 = arith.constant 0 : i32
    %c0_i32_0 = arith.constant 0 : i32
    %c0_i32_1 = arith.constant 0 : i32
    return %c0_i32, %c0_i32_0 : i32, i32
  }
  func.func @transform_3(%arg0: i32) -> (i32, i32) {
    %c0_i32 = arith.constant 0 : i32
    %c0_i32_0 = arith.constant 0 : i32
    %c0_i32_1 = arith.constant 0 : i32
    return %c0_i32, %c0_i32_0 : i32, i32
  }
  func.func @transform_4(%arg0: i32) -> (i32, i32) {
    %c0_i32 = arith.constant 0 : i32
    %c0_i32_0 = arith.constant 0 : i32
    return %arg0, %c0_i32 : i32, i32
  }
  func.func @transform_5(%arg0: i32) -> (i32, i32) {
    %c0_i32 = arith.constant 0 : i32
    %c0_i32_0 = arith.constant 0 : i32
    return %arg0, %c0_i32 : i32, i32
  }
}

</mosaic_0001>

<bundles_post_ra>
// kernel: tpu_custom_call.1
= control target key start
LH: loop header
LB: loop body
LE: loop exit
PB: predicated region body
PF: predicated region fallthrough
CT: control target
= control target key end

     0   :  { %11 = vsyncpa [#allocation3], 0  ;;  %s1064_s0 = inlined_call_operand.vmem [shape: f32[8,128], index: 0, kind: input, shape index: {}]   ;;  %s1065_s1 = inlined_call_operand.hbm [shape: f32[8,128], index: 1, kind: input, shape index: {}, may-alias: {1,5}]   ;;  %s1066_s2 = inlined_call_operand.hbm [shape: f32[128,640], index: 2, kind: input, shape index: {}]   ;;  %s1067_s3 = inlined_call_operand.vmem [shape: f32[1,512], index: 3, kind: input, shape index: {}]   ;;  %s1068_s4 = inlined_call_operand.hbm [shape: f32[8,128], index: 4, kind: output, shape index: {0}]   ;;  %s1069_s5 = inlined_call_operand.hbm [shape: f32[8,128], index: 5, kind: output, shape index: {1}, may-alias: {1,5}]  }
   0x1   :  { %12 = vsyncpa [#allocation6], 0 }
   0x2   :  { %13 = vsyncpa [#allocation4], 0 }
   0x3   :  { %14 = vsyncpa [#allocation9], 0  ;;  %s906_s18 = smov [#allocation2]   ;;  %s907_s20 = smov [#allocation5]  }
   0x4   :  { %s23_s19 = sshll.u32 %s906_s18, 4  ;;  %s32_s21 = sshll.u32 %s907_s20, 4  ;;  %s24_s19 = int_to_ptr.vmem [resolvable:$true] %s23_s19  ;;  %s33_s21 = int_to_ptr.vmem [resolvable:$true] %s32_s21 }
   0x5   :  { %s826_s22 = scalar_lea.vmem %s24_s19, 128  ;;  %p831_p1 = scmp.lt.s32.totalorder %s24_s19, %s24_s19 }
   0x6   :  { %p827_p0 = scmp.ne.s32.totalorder %s24_s19, %s826_s22  ;;  %p832_p2 = scmp.lt.s32.totalorder %s826_s22, %s826_s22 }
   0x8   :  { %p833_p3 = por %p832_p2, %p831_p1 }
   0xa   :  { %p834_p4 = pnand %p833_p3, %p827_p0 }
   0xc   :  { %837 = shalt.err (!%p834_p4)
}
   0xd   :  { %26 = dma.hbm_to_vmem [thread:$0]  %s1065_s1, 128, %s24_s19, [#allocation3]  }
   0xe   :  { %s846_s25 = scalar_lea.vmem %s33_s21, 10240  ;;  %p851_p6 = scmp.lt.s32.totalorder %s33_s21, %s33_s21 }
   0xf   :  { %p847_p5 = scmp.ne.s32.totalorder %s33_s21, %s846_s25  ;;  %p852_p7 = scmp.lt.s32.totalorder %s846_s25, %s846_s25 }
  0x11   :  { %p853_p8 = por %p852_p7, %p851_p6 }
  0x13   :  { %p854_p9 = pnand %p853_p8, %p847_p5 }
  0x15   :  { %857 = shalt.err (!%p854_p9)
}
  0x16   :  { %s908_s26 = smov 640   ;;  %s909_s27 = smov 40  }
  0x17   :  { %38 = dma.hbm_to_vmem [thread:$0]  %s1066_s2, 10240, %s33_s21, [#allocation6], %s908_s26, %s908_s26, %s909_s27  }
  0x18   :  { %898 = dma.done.wait [#allocation3], 128  }
  0x19   :  { %899 = vsyncadd [#allocation3], 4294967168 }
  0x1a   :  { %900 = dma.done.wait [#allocation6], 10240  }
  0x1b   :  { %901 = vsyncadd [#allocation6], 4294957056  ;;  %v910_v0 = vmov 0.0   ;;  %vm911_vm0 = vmmov 0   ;;  %v62_v1 = vld [vmem:[#allocation5 + $0x258] sm:$0xff]  ;;  %v61_v2 = vld [vmem:[#allocation5 + $0x230] sm:$0xff] }
  0x1c   :  { %633 = vmatprep.subr.mxu0 %v910_v0  ;;  %665 = vmatprep.mubr.msk.f32.mxu0 %vm911_vm0, %v910_v0  ;;  %v60_v3 = vld [vmem:[#allocation5 + $0x208] sm:$0xff]  ;;  %v59_v4 = vld [vmem:[#allocation5 + $0x1e0] sm:$0xff]  ;;  %v58_v6 = vld [vmem:[#allocation5 + $0x1b8] sm:$0xff]  ;;  %s912_s10 = smov [#allocation8]  }
  0x1d   :  { %668 = vmatprep.subr.mxu1 %v910_v0  ;;  %700 = vmatprep.mubr.msk.f32.mxu1 %vm911_vm0, %v910_v0  ;;  %v78_v5 = vld [vmem:[#allocation5 + $0x260] sm:$0xff]  ;;  %v77_v7 = vld [vmem:[#allocation5 + $0x238] sm:$0xff]  ;;  %v76_v8 = vld [vmem:[#allocation5 + $0x210] sm:$0xff]  ;;  %s530_s11 = sshll.u32 %s912_s10, 4  ;;  %s531_s11 = int_to_ptr.vmem [resolvable:$true] %s530_s11 }
  0x1e   :  { %634 = vmatpush3.msra.mxu0 %v62_v1  ;;  %669 = vmatpush3.msra.mxu1 %v78_v5  ;;  %v57_v9 = vld [vmem:[#allocation5 + $0x190] sm:$0xff]  ;;  %v75_v10 = vld [vmem:[#allocation5 + $0x1e8] sm:$0xff]  ;;  %v74_v12 = vld [vmem:[#allocation5 + $0x1c0] sm:$0xff]  ;;  %s858_s12 = scalar_lea.vmem %s531_s11, 128  ;;  %p863_p11 = scmp.lt.s32.totalorder %s531_s11, %s531_s11 }
  0x1f   :  { %635 = vmatprep.subr.mxu0 %v910_v0  ;;  %670 = vmatprep.subr.mxu1 %v910_v0  ;;  %v56_v11 = vld [vmem:[#allocation5 + $0x168] sm:$0xff]  ;;  %v55_v13 = vld [vmem:[#allocation5 + $0x140] sm:$0xff]  ;;  %v73_v14 = vld [vmem:[#allocation5 + $0x198] sm:$0xff]  ;;  %p859_p10 = scmp.ne.s32.totalorder %s531_s11, %s858_s12  ;;  %p864_p12 = scmp.lt.s32.totalorder %s858_s12, %s858_s12 }
  0x20   :  { %636 = vmatpush3.msra.mxu0 %v61_v2  ;;  %671 = vmatpush3.msra.mxu1 %v77_v7  ;;  %v54_v15 = vld [vmem:[#allocation5 + $0x118] sm:$0xff]  ;;  %v72_v16 = vld [vmem:[#allocation5 + $0x170] sm:$0xff]  ;;  %v71_v18 = vld [vmem:[#allocation5 + $0x148] sm:$0xff] }
  0x21   :  { %637 = vmatprep.subr.mxu0 %v910_v0  ;;  %672 = vmatprep.subr.mxu1 %v910_v0  ;;  %v53_v17 = vld [vmem:[#allocation5 + $0xf0] sm:$0xff]  ;;  %v52_v19 = vld [vmem:[#allocation5 + $0xc8] sm:$0xff]  ;;  %v70_v20 = vld [vmem:[#allocation5 + $0x120] sm:$0xff]  ;;  %p865_p13 = por %p864_p12, %p863_p11 }
  0x22   :  { %638 = vmatpush3.msra.mxu0 %v60_v3  ;;  %673 = vmatpush3.msra.mxu1 %v76_v8  ;;  %v51_v21 = vld [vmem:[#allocation5 + $0xa0] sm:$0xff]  ;;  %v69_v22 = vld [vmem:[#allocation5 + $0xf8] sm:$0xff]  ;;  %v68_v24 = vld [vmem:[#allocation5 + $0xd0] sm:$0xff] }
  0x23   :  { %639 = vmatprep.subr.mxu0 %v910_v0  ;;  %674 = vmatprep.subr.mxu1 %v910_v0  ;;  %v50_v23 = vld [vmem:[#allocation5 + $0x78] sm:$0xff]  ;;  %v49_v25 = vld [vmem:[#allocation5 + $0x50] sm:$0xff]  ;;  %v67_v26 = vld [vmem:[#allocation5 + $0xa8] sm:$0xff]  ;;  %p866_p0 = pnand %p865_p13, %p859_p10 }
  0x24   :  { %640 = vmatpush3.msra.mxu0 %v59_v4  ;;  %675 = vmatpush3.msra.mxu1 %v75_v10  ;;  %v48_v27 = vld [vmem:[#allocation5 + $0x28] sm:$0xff]  ;;  %v66_v28 = vld [vmem:[#allocation5 + $0x80] sm:$0xff]  ;;  %v131_v30 = vld [vmem:[%s1064_s0] sm:$0xff] }
  0x25   :  { %641 = vmatprep.subr.mxu0 %v910_v0  ;;  %676 = vmatprep.subr.mxu1 %v910_v0  ;;  %v47_v29 = vld [vmem:[#allocation5] sm:$0xff]  ;;  %v94_v31 = vld [vmem:[#allocation5 + $0x268] sm:$0xff]  ;;  %v65_v32 = vld [vmem:[#allocation5 + $0x58] sm:$0xff] }
  0x26   :  { %642 = vmatpush3.msra.mxu0 %v58_v6  ;;  %677 = vmatpush3.msra.mxu1 %v74_v12  ;;  %v93_v33 = vld [vmem:[#allocation5 + $0x240] sm:$0xff]  ;;  %v92_v34 = vld [vmem:[#allocation5 + $0x218] sm:$0xff]  ;;  %v91_v35 = vld [vmem:[#allocation5 + $0x1f0] sm:$0xff] }
  0x27   :  { %643 = vmatprep.subr.mxu0 %v910_v0  ;;  %678 = vmatprep.subr.mxu1 %v910_v0  ;;  %v90_v36 = vld [vmem:[#allocation5 + $0x1c8] sm:$0xff]  ;;  %v89_v37 = vld [vmem:[#allocation5 + $0x1a0] sm:$0xff]  ;;  %v88_v38 = vld [vmem:[#allocation5 + $0x178] sm:$0xff] }
  0x28   :  { %644 = vmatpush3.msra.mxu0 %v57_v9  ;;  %679 = vmatpush3.msra.mxu1 %v73_v14  ;;  %v87_v39 = vld [vmem:[#allocation5 + $0x150] sm:$0xff]  ;;  %v86_v40 = vld [vmem:[#allocation5 + $0x128] sm:$0xff]  ;;  %v85_v41 = vld [vmem:[#allocation5 + $0x100] sm:$0xff] }
  0x29   :  { %645 = vmatprep.subr.mxu0 %v910_v0  ;;  %680 = vmatprep.subr.mxu1 %v910_v0  ;;  %v84_v42 = vld [vmem:[#allocation5 + $0xd8] sm:$0xff]  ;;  %v83_v43 = vld [vmem:[#allocation5 + $0xb0] sm:$0xff]  ;;  %v82_v44 = vld [vmem:[#allocation5 + $0x88] sm:$0xff] }
  0x2a   :  { %646 = vmatpush3.msra.mxu0 %v56_v11  ;;  %681 = vmatpush3.msra.mxu1 %v72_v16  ;;  %v81_v45 = vld [vmem:[#allocation5 + $0x60] sm:$0xff]  ;;  %v64_v46 = vld [vmem:[#allocation5 + $0x30] sm:$0xff]  ;;  %v80_v47 = vld [vmem:[#allocation5 + $0x38] sm:$0xff] }
  0x2b   :  { %647 = vmatprep.subr.mxu0 %v910_v0  ;;  %682 = vmatprep.subr.mxu1 %v910_v0  ;;  %v63_v48 = vld [vmem:[#allocation5 + $0x8] sm:$0xff]  ;;  %v79_v49 = vld [vmem:[#allocation5 + $0x10] sm:$0xff]  ;;  %v280_v50 = vld [vmem:[#allocation2] sm:$0xff] }
  0x2c   :  { %648 = vmatpush3.msra.mxu0 %v55_v13  ;;  %683 = vmatpush3.msra.mxu1 %v71_v18  ;;  %v110_v53 = vld [vmem:[#allocation5 + $0x270] sm:$0xff]  ;;  %v109_v55 = vld [vmem:[#allocation5 + $0x248] sm:$0xff]  ;;  %v108_v56 = vld [vmem:[#allocation5 + $0x220] sm:$0xff] }
  0x2d   :  { %649 = vmatprep.subr.mxu0 %v910_v0  ;;  %684 = vmatprep.subr.mxu1 %v910_v0  ;;  %v107_v57 = vld [vmem:[#allocation5 + $0x1f8] sm:$0xff]  ;;  %v106_v58 = vld [vmem:[#allocation5 + $0x1d0] sm:$0xff]  ;;  %v105_v59 = vld [vmem:[#allocation5 + $0x1a8] sm:$0xff] }
  0x2e   :  { %650 = vmatpush3.msra.mxu0 %v54_v15  ;;  %685 = vmatpush3.msra.mxu1 %v70_v20  ;;  %v104_v61 = vld [vmem:[#allocation5 + $0x180] sm:$0xff]  ;;  %v103_v63 = vld [vmem:[#allocation5 + $0x158] sm:$0xff]  ;;  %v102_v1 = vld [vmem:[#allocation5 + $0x130] sm:$0xff] }
  0x2f   :  { %651 = vmatprep.subr.mxu0 %v910_v0  ;;  %686 = vmatprep.subr.mxu1 %v910_v0  ;;  %v101_v2 = vld [vmem:[#allocation5 + $0x108] sm:$0xff]  ;;  %v100_v3 = vld [vmem:[#allocation5 + $0xe0] sm:$0xff]  ;;  %v99_v4 = vld [vmem:[#allocation5 + $0xb8] sm:$0xff] }
  0x30   :  { %652 = vmatpush3.msra.mxu0 %v53_v17  ;;  %687 = vmatpush3.msra.mxu1 %v69_v22  ;;  %v98_v5 = vld [vmem:[#allocation5 + $0x90] sm:$0xff]  ;;  %v97_v6 = vld [vmem:[#allocation5 + $0x68] sm:$0xff]  ;;  %v96_v7 = vld [vmem:[#allocation5 + $0x40] sm:$0xff] }
  0x31   :  { %653 = vmatprep.subr.mxu0 %v910_v0  ;;  %688 = vmatprep.subr.mxu1 %v910_v0  ;;  %v95_v8 = vld [vmem:[#allocation5 + $0x18] sm:$0xff]  ;;  %v125_v10 = vld [vmem:[#allocation5 + $0x250] sm:$0xff]  ;;  %v124_v11 = vld [vmem:[#allocation5 + $0x228] sm:$0xff] }
  0x32   :  { %654 = vmatpush3.msra.mxu0 %v52_v19  ;;  %689 = vmatpush3.msra.mxu1 %v68_v24  ;;  %v126_v9 = vld [vmem:[#allocation5 + $0x278] sm:$0xff]  ;;  %v123_v12 = vld [vmem:[#allocation5 + $0x200] sm:$0xff]  ;;  %v121_v14 = vld [vmem:[#allocation5 + $0x1b0] sm:$0xff] }
  0x33   :  { %655 = vmatprep.subr.mxu0 %v910_v0  ;;  %690 = vmatprep.subr.mxu1 %v910_v0  ;;  %v122_v13 = vld [vmem:[#allocation5 + $0x1d8] sm:$0xff]  ;;  %v120_v15 = vld [vmem:[#allocation5 + $0x188] sm:$0xff]  ;;  %v119_v16 = vld [vmem:[#allocation5 + $0x160] sm:$0xff] }
  0x34   :  { %656 = vmatpush3.msra.mxu0 %v51_v21  ;;  %691 = vmatpush3.msra.mxu1 %v67_v26  ;;  %v118_v17 = vld [vmem:[#allocation5 + $0x138] sm:$0xff]  ;;  %v117_v18 = vld [vmem:[#allocation5 + $0x110] sm:$0xff]  ;;  %v116_v19 = vld [vmem:[#allocation5 + $0xe8] sm:$0xff] }
  0x35   :  { %657 = vmatprep.subr.mxu0 %v910_v0  ;;  %692 = vmatprep.subr.mxu1 %v910_v0  ;;  %v115_v20 = vld [vmem:[#allocation5 + $0xc0] sm:$0xff]  ;;  %v114_v21 = vld [vmem:[#allocation5 + $0x98] sm:$0xff] }
  0x36   :  { %658 = vmatpush3.msra.mxu0 %v50_v23  ;;  %693 = vmatpush3.msra.mxu1 %v66_v28  ;;  %v544_v22 = vld [vmem:[%s1067_s3] ss:$0 sm:$0xff]  ;;  %v545_v23 = vld [vmem:[%s1067_s3 + $0x1] ss:$0 sm:$0xff] }
  0x37   :  { %659 = vmatprep.subr.mxu0 %v910_v0  ;;  %694 = vmatprep.subr.mxu1 %v910_v0 }
  0x38   :  { %660 = vmatpush3.msra.mxu0 %v49_v25  ;;  %695 = vmatpush3.msra.mxu1 %v65_v32  ;;  %v112_v32 = vld [vmem:[#allocation5 + $0x48] sm:$0xff] }
  0x39   :  { %661 = vmatprep.subr.mxu0 %v910_v0  ;;  %696 = vmatprep.subr.mxu1 %v910_v0 }
  0x3a   :  { %662 = vmatpush3.msra.mxu0 %v48_v27  ;;  %697 = vmatpush3.msra.mxu1 %v64_v46 }
  0x3b   :  { %663 = vmatprep.subr.mxu0 %v910_v0  ;;  %698 = vmatprep.subr.mxu1 %v910_v0 }
  0x3c   :  { %664 = vmatpush3.msra.mxu0 %v47_v29  ;;  %699 = vmatpush3.msra.mxu1 %v63_v48 }
  0x3d   :  { %666 = vmatmul.mubr.f32.vlgmr.msra.gmra.mxu0 %v131_v30  ;;  %703 = vmatprep.subr.mxu0 %v910_v0 }
  0x3e   :  { %704 = vmatpush3.msra.mxu0 %v94_v31  ;;  %735 = vmatprep.mubr.msk.f32.mxu0 %vm911_vm0, %v910_v0  ;;  %v113_v31 = vld [vmem:[#allocation5 + $0x70] sm:$0xff] }
  0x3f   :  { %705 = vmatprep.subr.mxu0 %v910_v0  ;;  %738 = vmatprep.subr.mxu1 %v910_v0 }
  0x40   :  { %706 = vmatpush3.msra.mxu0 %v93_v33  ;;  %v111_v33 = vld [vmem:[#allocation5 + $0x20] sm:$0xff] }
  0x41   :  { %707 = vmatprep.subr.mxu0 %v910_v0 }
  0x42   :  { %708 = vmatpush3.msra.mxu0 %v92_v34  ;;  %v546_v34 = vld [vmem:[%s1067_s3 + $0x2] ss:$0 sm:$0xff] }
  0x43   :  { %709 = vmatprep.subr.mxu0 %v910_v0 }
  0x44   :  { %710 = vmatpush3.msra.mxu0 %v91_v35 }
  0x45   :  { %711 = vmatprep.subr.mxu0 %v910_v0 }
  0x46   :  { %712 = vmatpush3.msra.mxu0 %v90_v36 }
  0x47   :  { %713 = vmatprep.subr.mxu0 %v910_v0 }
  0x48   :  { %714 = vmatpush3.msra.mxu0 %v89_v37 }
  0x49   :  { %715 = vmatprep.subr.mxu0 %v910_v0 }
  0x4a   :  { %716 = vmatpush3.msra.mxu0 %v88_v38 }
  0x4b   :  { %717 = vmatprep.subr.mxu0 %v910_v0 }
  0x4c   :  { %718 = vmatpush3.msra.mxu0 %v87_v39 }
  0x4d   :  { %719 = vmatprep.subr.mxu0 %v910_v0 }
  0x4e   :  { %720 = vmatpush3.msra.mxu0 %v86_v40 }
  0x4f   :  { %721 = vmatprep.subr.mxu0 %v910_v0 }
  0x50   :  { %722 = vmatpush3.msra.mxu0 %v85_v41 }
  0x51   :  { %723 = vmatprep.subr.mxu0 %v910_v0 }
  0x52   :  { %724 = vmatpush3.msra.mxu0 %v84_v42 }
  0x53   :  { %725 = vmatprep.subr.mxu0 %v910_v0 }
  0x54   :  { %726 = vmatpush3.msra.mxu0 %v83_v43 }
  0x55   :  { %727 = vmatprep.subr.mxu0 %v910_v0 }
  0x56   :  { %728 = vmatpush3.msra.mxu0 %v82_v44 }
  0x57   :  { %729 = vmatprep.subr.mxu0 %v910_v0 }
  0x58   :  { %730 = vmatpush3.msra.mxu0 %v81_v45 }
  0x59   :  { %731 = vmatprep.subr.mxu0 %v910_v0 }
  0x5a   :  { %732 = vmatpush3.msra.mxu0 %v80_v47 }
  0x5b   :  { %733 = vmatprep.subr.mxu0 %v910_v0 }
  0x5c   :  { %734 = vmatpush3.msra.mxu0 %v79_v49 }
  0x5d   :  { %736 = vmatmul.mubr.f32.vlgmr.msra.gmra.mxu0 %v280_v50  ;;  %773 = vmatprep.subr.mxu0 %v910_v0 }
  0x5e   :  { %805 = vmatprep.mubr.msk.f32.mxu0 %vm911_vm0, %v910_v0  ;;  %774 = vmatpush3.msra.mxu0 %v126_v9 }
  0x5f   :  { %775 = vmatprep.subr.mxu0 %v910_v0 }
  0x60   :  { %776 = vmatpush3.msra.mxu0 %v125_v10 }
  0x61   :  { %777 = vmatprep.subr.mxu0 %v910_v0 }
  0x62   :  { %778 = vmatpush3.msra.mxu0 %v124_v11 }
  0x63   :  { %779 = vmatprep.subr.mxu0 %v910_v0 }
  0x64   :  { %780 = vmatpush3.msra.mxu0 %v123_v12 }
  0x65   :  { %781 = vmatprep.subr.mxu0 %v910_v0 }
  0x66   :  { %782 = vmatpush3.msra.mxu0 %v122_v13 }
  0x67   :  { %783 = vmatprep.subr.mxu0 %v910_v0 }
  0x68   :  { %784 = vmatpush3.msra.mxu0 %v121_v14 }
  0x69   :  { %785 = vmatprep.subr.mxu0 %v910_v0 }
  0x6a   :  { %786 = vmatpush3.msra.mxu0 %v120_v15 }
  0x6b   :  { %787 = vmatprep.subr.mxu0 %v910_v0 }
  0x6c   :  { %788 = vmatpush3.msra.mxu0 %v119_v16 }
  0x6d   :  { %789 = vmatprep.subr.mxu0 %v910_v0 }
  0x6e   :  { %790 = vmatpush3.msra.mxu0 %v118_v17 }
  0x6f   :  { %791 = vmatprep.subr.mxu0 %v910_v0 }
  0x70   :  { %792 = vmatpush3.msra.mxu0 %v117_v18 }
  0x71   :  { %793 = vmatprep.subr.mxu0 %v910_v0 }
  0x72   :  { %794 = vmatpush3.msra.mxu0 %v116_v19 }
  0x73   :  { %795 = vmatprep.subr.mxu0 %v910_v0 }
  0x74   :  { %796 = vmatpush3.msra.mxu0 %v115_v20 }
  0x75   :  { %797 = vmatprep.subr.mxu0 %v910_v0 }
  0x76   :  { %798 = vmatpush3.msra.mxu0 %v114_v21 }
  0x77   :  { %799 = vmatprep.subr.mxu0 %v910_v0 }
  0x78   :  { %800 = vmatpush3.msra.mxu0 %v113_v31 }
  0x79   :  { %801 = vmatprep.subr.mxu0 %v910_v0 }
  0x7a   :  { %802 = vmatpush3.msra.mxu0 %v112_v32 }
  0x7b   :  { %803 = vmatprep.subr.mxu0 %v910_v0 }
  0x7c   :  { %804 = vmatpush3.msra.mxu0 %v111_v33 }
  0xfd   :  { %v198_v51 = vpop.f32.mrf.mxu0 }
  0xfe   :  { %v202_v52 = vmax.f32 %v198_v51, 0.0 }
  0xff   :  { %v667_v54 = vpop.f32.mrf.mxu0 }
 0x100   :  { %701 = vmatmul.mubr.f32.vlgmr.msra.gmra.mxu1 %v202_v52 }
 0x101   :  { %739 = vmatpush3.msra.mxu1 %v110_v53  ;;  %770 = vmatprep.mubr.msk.f32.mxu1 %vm911_vm0, %v910_v0 }
 0x102   :  { %740 = vmatprep.subr.mxu1 %v910_v0 }
 0x103   :  { %741 = vmatpush3.msra.mxu1 %v109_v55 }
 0x104   :  { %742 = vmatprep.subr.mxu1 %v910_v0 }
 0x105   :  { %743 = vmatpush3.msra.mxu1 %v108_v56 }
 0x106   :  { %744 = vmatprep.subr.mxu1 %v910_v0 }
 0x107   :  { %745 = vmatpush3.msra.mxu1 %v107_v57 }
 0x108   :  { %746 = vmatprep.subr.mxu1 %v910_v0 }
 0x109   :  { %747 = vmatpush3.msra.mxu1 %v106_v58 }
 0x10a   :  { %748 = vmatprep.subr.mxu1 %v910_v0 }
 0x10b   :  { %749 = vmatpush3.msra.mxu1 %v105_v59 }
 0x10c   :  { %750 = vmatprep.subr.mxu1 %v910_v0 }
 0x10d   :  { %751 = vmatpush3.msra.mxu1 %v104_v61 }
 0x10e   :  { %752 = vmatprep.subr.mxu1 %v910_v0 }
 0x10f   :  { %753 = vmatpush3.msra.mxu1 %v103_v63 }
 0x110   :  { %754 = vmatprep.subr.mxu1 %v910_v0 }
 0x111   :  { %755 = vmatpush3.msra.mxu1 %v102_v1 }
 0x112   :  { %756 = vmatprep.subr.mxu1 %v910_v0 }
 0x113   :  { %757 = vmatpush3.msra.mxu1 %v101_v2 }
 0x114   :  { %758 = vmatprep.subr.mxu1 %v910_v0 }
 0x115   :  { %759 = vmatpush3.msra.mxu1 %v100_v3 }
 0x116   :  { %760 = vmatprep.subr.mxu1 %v910_v0 }
 0x117   :  { %761 = vmatpush3.msra.mxu1 %v99_v4 }
 0x118   :  { %762 = vmatprep.subr.mxu1 %v910_v0 }
 0x119   :  { %763 = vmatpush3.msra.mxu1 %v98_v5 }
 0x11a   :  { %764 = vmatprep.subr.mxu1 %v910_v0 }
 0x11b   :  { %765 = vmatpush3.msra.mxu1 %v97_v6 }
 0x11c   :  { %766 = vmatprep.subr.mxu1 %v910_v0 }
 0x11d   :  { %v1018_v60 = vpop.f32.mrf.mxu0  ;;  %767 = vmatpush3.msra.mxu1 %v96_v7 }
 0x11e   :  { %768 = vmatprep.subr.mxu1 %v910_v0  ;;  %v354_v26 = vadd.f32 %v545_v23, %v1018_v60 }
 0x11f   :  { %v737_v62 = vpop.f32.mrf.mxu0  ;;  %769 = vmatpush3.msra.mxu1 %v95_v8 }
 0x1c0   :  { %v275_v24 = vpop.f32.mrf.mxu1 }
 0x1c1   :  { %v276_v25 = vadd.f32 %v544_v22, %v275_v24 }
 0x1c2   :  { %v702_v27 = vpop.f32.mrf.mxu1 }
 0x1c3   :  { %v279_v28 = vmax.f32 %v276_v25, 0.0 }
 0x1c5   :  { %v357_v29 = vadd.f32 %v354_v26, %v279_v28 }
 0x1c7   :  { %816 = vtanh.f32 %v357_v29 }
 0x1d4   :  { %v817_v30 = vpop.eup %816 }
 0x1d5   :  { %513 = vst [vmem:[#allocation8] sm:$0xff] %v817_v30  ;;  %771 = vmatmul.mubr.f32.vlgmr.msra.gmra.mxu1 %v817_v30 }
 0x295   :  { %v431_v35 = vpop.f32.mrf.mxu1 }
 0x296   :  { %v432_v36 = vadd.f32 %v546_v34, %v431_v35 }
 0x297   :  { %v772_v37 = vpop.f32.mrf.mxu1 }
 0x298   :  { %v435_v38 = vmax.f32 %v432_v36, 0.0 }
 0x29a   :  { %806 = vmatmul.mubr.f32.vlgmr.msra.gmra.mxu0 %v435_v38 }
 0x29b   :  { %869 = shalt.err (!%p866_p0)
}
 0x29c   :  { %533 = dma.vmem_to_hbm [thread:$0]  %s531_s11, 128, %s1069_s5, [#allocation9]   ;;  %v547_v0 = vld [vmem:[%s1067_s3 + $0x3] ss:$0 sm:$0xff] }
 0x29d   :  { %s913_s17 = smov [#allocation7]  }
 0x29e   :  { %s520_s18 = sshll.u32 %s913_s17, 4  ;;  %s521_s18 = int_to_ptr.vmem [resolvable:$true] %s520_s18 }
 0x29f   :  { %s878_s19 = scalar_lea.vmem %s521_s18, 128  ;;  %p883_p2 = scmp.lt.s32.totalorder %s521_s18, %s521_s18 }
 0x2a0   :  { %p879_p1 = scmp.ne.s32.totalorder %s521_s18, %s878_s19  ;;  %p884_p3 = scmp.lt.s32.totalorder %s878_s19, %s878_s19 }
 0x2a2   :  { %p885_p4 = por %p884_p3, %p883_p2 }
 0x2a4   :  { %p886_p5 = pnand %p885_p4, %p879_p1 }
 0x35a   :  { %v508_v39 = vpop.f32.mrf.mxu0 }
 0x35b   :  { %v509_v40 = vadd.f32 %v547_v0, %v508_v39 }
 0x35c   :  { %v807_v41 = vpop.f32.mrf.mxu0 }
 0x35d   :  { %512 = vst [vmem:[#allocation7] sm:$0xff] %v509_v40 }
 0x35e   :  { %889 = shalt.err (!%p886_p5)
}
 0x35f   :  { %523 = dma.vmem_to_hbm [thread:$0]  %s521_s18, 128, %s1068_s4, [#allocation4]  }
 0x360   :  { %902 = dma.done.wait [#allocation4], 128  }
 0x361   :  { %903 = vsyncadd [#allocation4], 4294967168 }
 0x362   :  { %904 = dma.done.wait [#allocation9], 128  }
 0x363   :  { %905 = vsyncadd [#allocation9], 4294967168 }
 0x364   :  { %540 = vsyncpa [#allocation3], 1 }
 0x365   :  { %541 = vsyncpa [#allocation6], 1 }
 0x366   :  { %542 = vsyncpa [#allocation4], 1 }
 0x367   :  { %543 = vsyncpa [#allocation9], 1 }

</bundles_post_ra>
